<compile_context>
chip_gen: v6e
topology: v6e:2x2x1
jax: 0.10.0
libtpu: 0.0.40
codegen_flags: <defaults>
</compile_context>

<pallas_src>
import jax
import jax.numpy as jnp
from jax.experimental import pallas as pl
from jax.experimental.pallas import tpu as pltpu

IN_FEATURES = 256
OUT_FEATURES = 256

_SINGLE_BLOCK_MAX_B = 128   # launch-bound regime: one block, no grid
_MAX_BLOCK_B = 2048         # ~4 MB/step f32; double-buffered x+out + W fits scoped VMEM


def _linear_hardsig_kernel(x_ref, w_ref, b_ref, o_ref):
    x = x_ref[...]
    if x.dtype != w_ref.dtype:          # static (trace-time) branch
        x = x.astype(w_ref.dtype)       # only when x is genuinely f32 in HBM
    # MXU matmul, f32 accumulation.
    y = jnp.dot(x, w_ref[...], preferred_element_type=jnp.float32)
    y = y + b_ref[...].astype(jnp.float32)     # bias broadcasts over batch rows
    # Hardsigmoid: +3 and /6 already folded into (W, b) -> clamp to [0, 1] on the VPU.
    y = jnp.minimum(jnp.maximum(y, 0.0), 1.0)
    o_ref[...] = y.astype(o_ref.dtype)


def prepare_params(w, b, *, param_dtype=jnp.float32):
    """Fold the hardsigmoid constants into the linear parameters (one-time prep).

    clamp(x@W + b + 3, 0, 6) / 6  ==  clamp(x@(W/6) + (b+3)/6, 0, 1)

    `param_dtype=jnp.bfloat16` halves the weight DMA; bf16 is the native MXU input
    dtype on v5e, v6e and v7x.  Bias stays f32 (it is added post-accumulation).
    Note the bf16 path rounds W/6 (and casts f32 activations) to bf16, so numerics
    differ slightly from PyTorch's f32 Linear.
    """
    w_folded = (w / 6.0).astype(param_dtype)
    b_folded = ((b + 3.0) / 6.0).astype(jnp.float32)
    return w_folded, b_folded


def _cost_estimate(B, x_dtype, w_dtype, out_dtype):
    """Advisory cost hint so XLA can schedule around this tiny custom call."""
    bytes_accessed = (
        B * IN_FEATURES * jnp.dtype(x_dtype).itemsize
        + IN_FEATURES * OUT_FEATURES * jnp.dtype(w_dtype).itemsize
        + OUT_FEATURES * 4                                   # bias (f32)
        + B * OUT_FEATURES * jnp.dtype(out_dtype).itemsize)  # output
    return pl.CostEstimate(
        flops=2 * B * IN_FEATURES * OUT_FEATURES,
        transcendentals=0,
        bytes_accessed=bytes_accessed)


def _choose_block_b(B):
    """Pick a batch tile.

    B <= 128: single block (launch-bound).  Otherwise: at least 2 "parallel" grid
    steps (so both v7x TensorCores get work), tile a multiple of 8 rows, capped at
    2048 rows to amortize per-step overhead while staying inside scoped VMEM.
    Prefer a tile that divides B exactly (no padded boundary tile) if one exists
    near the target size.
    """
    if B <= _SINGLE_BLOCK_MAX_B:
        return B
    target = min(_MAX_BLOCK_B, 8 * pl.cdiv(pl.cdiv(B, 2), 8))
    lo = max(8, (target * 3 // 4) // 8 * 8)
    for t in range(target, lo - 1, -8):
        if B % t == 0:
            return t
    return target


def linear_hardsig(x, w_folded, b_folded, *, block_b=None, out_dtype=jnp.float32):
    """x: (B, 256), w_folded: (256, 256) [in, out], b_folded: (1, 256) -> (B, 256).

    `out_dtype=jnp.bfloat16` is safe (values already clamped to [0, 1]) and cuts
    write traffic in half on the bandwidth-bound large-batch path.
    """
    B = x.shape[0]
    if block_b is None:
        block_b = _choose_block_b(B)
    cost = _cost_estimate(B, x.dtype, w_folded.dtype, out_dtype)

    if B <= block_b:
        # Launch-bound regime (the module's real B=1 shape): one block per operand,
        # no grid, no double-buffering.  Blocks equal the full array dims, so the
        # (8,128) rule is trivially met.
        # TODO(synk): for repeated inference calls, keep W (and b) resident in VMEM
        # across invocations via the cross-pallas_call prefetch pattern (setup call
        # returning a DMA semaphore + VMEM ref, has_side_effects=True) instead of
        # re-DMAing 128-256 KB of weights per call; omitted here to keep this script
        # robust across JAX builds.
        return pl.pallas_call(
            _linear_hardsig_kernel,
            out_shape=jax.ShapeDtypeStruct((B, OUT_FEATURES), out_dtype),
            cost_estimate=cost,
        )(x, w_folded, b_folded)

    # Batch-tiled path: "parallel" lets megacore (v7x) shard the batch axis across
    # TensorCores; pipelining double-buffers the x / out tiles.  W and b have a
    # constant index_map, so they are DMA'd once per call, not per step.
    assert block_b % 8 == 0, "batch tile must be a multiple of 8 (f32 sublane)"
    grid_steps = pl.cdiv(B, block_b)
    b_padded = grid_steps * block_b
    # Ragged batch: pad to a whole number of tiles, slice the result afterwards.
    x_in = x if b_padded == B else jnp.pad(x, ((0, b_padded - B), (0, 0)))

    out = pl.pallas_call(
        _linear_hardsig_kernel,
        out_shape=jax.ShapeDtypeStruct((b_padded, OUT_FEATURES), out_dtype),
        grid=(grid_steps,),
        in_specs=[
            pl.BlockSpec((block_b, IN_FEATURES), lambda i: (i, 0)),
            # Constant block index -> fetched once, stays resident across steps.
            # TODO(synk): pipeline_mode=pl.Buffered(1) on W/b would drop their unused
            # second pipeline buffer (~0.75 MB f32); omitted for compatibility headroom.
            pl.BlockSpec((IN_FEATURES, OUT_FEATURES), lambda i: (0, 0)),
            pl.BlockSpec((1, OUT_FEATURES), lambda i: (0, 0)),
        ],
        out_specs=pl.BlockSpec((block_b, OUT_FEATURES), lambda i: (i, 0)),
        compiler_params=pltpu.CompilerParams(
            dimension_semantics=("parallel",)),
        cost_estimate=cost,
    )(x_in, w_folded, b_folded)
    return out if b_padded == B else out[:B]


if __name__ == "__main__":
    key = jax.random.PRNGKey(0)
    k_x, k_w, k_b, k_xb, k_xr = jax.random.split(key, 5)

    # Deterministic init mimicking nn.Linear's uniform(-1/sqrt(in), 1/sqrt(in)).
    bound = 1.0 / (IN_FEATURES ** 0.5)
    # Torch stores weight as (out, in); we keep it transposed as (in, out) for x @ W.
    w = jax.random.uniform(k_w, (IN_FEATURES, OUT_FEATURES), jnp.float32,
                           minval=-bound, maxval=bound)
    b = jax.random.uniform(k_b, (1, OUT_FEATURES), jnp.float32,
                           minval=-bound, maxval=bound)

    def ref_fn(x):
        # Plain-JAX reference with the *original* (unfolded) module semantics.
        return jnp.minimum(jnp.maximum(x @ w + b + 3.0, 0.0), 6.0) / 6.0

    w_f32, b_f32 = prepare_params(w, b)                       # constants folded, f32

    # --- Case 1: the module's actual shape (1, 256), f32 -> single-block path. ---
    x1 = jax.random.normal(k_x, (1, IN_FEATURES), dtype=jnp.float32)
    out1 = jax.block_until_ready(linear_hardsig(x1, w_f32, b_f32))
    assert out1.shape == (1, OUT_FEATURES) and out1.dtype == jnp.float32
    assert jnp.allclose(out1, ref_fn(x1), atol=1e-5, rtol=1e-5)

    # --- Case 2: B=384 -> auto-tiled grid of 2 "parallel" steps (192 rows each). ---
    xb = jax.random.normal(k_xb, (384, IN_FEATURES), dtype=jnp.float32)
    out2 = jax.block_until_ready(linear_hardsig(xb, w_f32, b_f32))
    assert out2.shape == (384, OUT_FEATURES)
    assert jnp.allclose(out2, ref_fn(xb), atol=1e-5, rtol=1e-5)

    # --- Case 3: ragged batch B=260, bf16 weights/activations/output end-to-end. ---
    xr_f32 = jax.random.normal(k_xr, (260, IN_FEATURES), dtype=jnp.float32)
    xr_bf16 = xr_f32.astype(jnp.bfloat16)     # stands in for an upstream bf16 producer
    w_bf16, b_for_bf16 = prepare_params(w, b, param_dtype=jnp.bfloat16)
    out3 = jax.block_until_ready(
        linear_hardsig(xr_bf16, w_bf16, b_for_bf16, out_dtype=jnp.bfloat16))
    assert out3.shape == (260, OUT_FEATURES) and out3.dtype == jnp.bfloat16
    assert jnp.allclose(out3.astype(jnp.float32), ref_fn(xr_f32), atol=2e-2, rtol=2e-2)

    print("KERNEL_OK")
</pallas_src>

<mosaic_0001>
module attributes {stable_mosaic.version = 11 : i64} {
  func.func @_linear_hardsig_kernel(%arg0: memref<1x256xf32, #tpu.memory_space<vmem>>, %arg1: memref<256x256xf32, #tpu.memory_space<vmem>>, %arg2: memref<1x256xf32, #tpu.memory_space<vmem>>, %arg3: memref<1x256xf32, #tpu.memory_space<vmem>>) attributes {dimension_semantics = [], scalar_prefetch = 0 : i64, scratch_operands = 0 : i64, tpu.core_type = #tpu.core_type<tc>} {
    %c0 = arith.constant 0 : index
    %c0_0 = arith.constant 0 : index
    %0 = vector.load %arg0[%c0, %c0_0] : memref<1x256xf32, #tpu.memory_space<vmem>>, vector<1x256xf32>
    %c0_1 = arith.constant 0 : index
    %c0_2 = arith.constant 0 : index
    %1 = vector.load %arg1[%c0_1, %c0_2] : memref<256x256xf32, #tpu.memory_space<vmem>>, vector<256x256xf32>
    %cst = arith.constant dense<0.000000e+00> : vector<1x256xf32>
    %2 = tpu.matmul %0, %1, %cst {dimension_numbers = #tpu.dot_dimension_numbers<[1], [0], [0], [1], [0, 0, 1, 1], [], []>} : vector<1x256xf32>, vector<256x256xf32>, vector<1x256xf32> -> vector<1x256xf32>
    %c0_3 = arith.constant 0 : index
    %c0_4 = arith.constant 0 : index
    %3 = vector.load %arg2[%c0_3, %c0_4] : memref<1x256xf32, #tpu.memory_space<vmem>>, vector<1x256xf32>
    %4 = arith.addf %2, %3 : vector<1x256xf32>
    %cst_5 = arith.constant 0.000000e+00 : f32
    %5 = vector.broadcast %cst_5 : f32 to vector<1x256xf32>
    %6 = arith.maximumf %4, %5 : vector<1x256xf32>
    %cst_6 = arith.constant 1.000000e+00 : f32
    %7 = vector.broadcast %cst_6 : f32 to vector<1x256xf32>
    %8 = arith.minimumf %6, %7 : vector<1x256xf32>
    %c0_7 = arith.constant 0 : index
    %c0_8 = arith.constant 0 : index
    %9 = vector.load %arg3[%c0_7, %c0_8] : memref<1x256xf32, #tpu.memory_space<vmem>>, vector<1x256xf32>
    tpu.vector_store %arg3[%c0_7, %c0_8], %8 {strides = array<i32>} : memref<1x256xf32, #tpu.memory_space<vmem>>, vector<1x256xf32>,
    return
  }
}

</mosaic_0001>

<bundles_post_ra>
// kernel: tpu_custom_call.1
= control target key start
LH: loop header
LB: loop body
LE: loop exit
PB: predicated region body
PF: predicated region fallthrough
CT: control target
= control target key end

     0   :  { %8 = vsyncpa [#allocation3], 0  ;;  %s368_s0 = inlined_call_operand.hbm [shape: f32[1,256], index: 0, kind: input, shape index: {}]   ;;  %s369_s1 = inlined_call_operand.hbm [shape: f32[256,256], index: 1, kind: input, shape index: {}]   ;;  %s370_s2 = inlined_call_operand.vmem [shape: f32[1,256], index: 2, kind: input, shape index: {}]   ;;  %s371_s3 = inlined_call_operand.hbm [shape: f32[1,256], index: 3, kind: output, shape index: {}]  }
   0x1   :  { %9 = vsyncpa [#allocation6], 0 }
   0x2   :  { %10 = vsyncpa [#allocation4], 0  ;;  %s315_s12 = smov [#allocation2]   ;;  %s316_s14 = smov [#allocation5]  }
   0x3   :  { %s17_s13 = sshll.u32 %s315_s12, 4  ;;  %s26_s15 = sshll.u32 %s316_s14, 4  ;;  %s18_s13 = int_to_ptr.vmem [resolvable:$true] %s17_s13  ;;  %s27_s15 = int_to_ptr.vmem [resolvable:$true] %s26_s15 }
   0x4   :  { %s257_s16 = scalar_lea.vmem %s18_s13, 32  ;;  %p262_p1 = scmp.lt.s32.totalorder %s18_s13, %s18_s13 }
   0x5   :  { %p258_p0 = scmp.ne.s32.totalorder %s18_s13, %s257_s16  ;;  %p263_p2 = scmp.lt.s32.totalorder %s257_s16, %s257_s16 }
   0x7   :  { %p264_p3 = por %p263_p2, %p262_p1 }
   0x9   :  { %p265_p4 = pnand %p264_p3, %p258_p0 }
   0xb   :  { %268 = shalt.err (!%p265_p4)
}
   0xc   :  { %20 = dma.hbm_to_vmem [thread:$0]  %s368_s0, 32, %s18_s13, [#allocation3]  }
   0xd   :  { %s277_s19 = scalar_lea.vmem %s27_s15, 8192  ;;  %p282_p6 = scmp.lt.s32.totalorder %s27_s15, %s27_s15 }
   0xe   :  { %p278_p5 = scmp.ne.s32.totalorder %s27_s15, %s277_s19  ;;  %p283_p7 = scmp.lt.s32.totalorder %s277_s19, %s277_s19 }
  0x10   :  { %p284_p8 = por %p283_p7, %p282_p6 }
  0x12   :  { %p285_p9 = pnand %p284_p8, %p278_p5 }
  0x14   :  { %288 = shalt.err (!%p285_p9)
}
  0x15   :  { %s317_s20 = smov 256   ;;  %s318_s21 = smov 16  }
  0x16   :  { %32 = dma.hbm_to_vmem [thread:$0]  %s369_s1, 8192, %s27_s15, [#allocation6], %s317_s20, %s317_s20, %s318_s21  }
  0x17   :  { %309 = dma.done.wait [#allocation3], 32  }
  0x18   :  { %310 = vsyncadd [#allocation3], 4294967264 }
  0x19   :  { %311 = dma.done.wait [#allocation6], 8192  }
  0x1a   :  { %312 = vsyncadd [#allocation6], 4294959104  ;;  %v73_v0 = vld [vmem:[#allocation5 + $0xf8] sm:$0xff]  ;;  %v72_v1 = vld [vmem:[#allocation5 + $0xf0] sm:$0xff]  ;;  %v108_v13 = vlaneseq  ;;  %s320_s24 = smov [#allocation7]  }
  0x1b   :  { %v71_v2 = vld [vmem:[#allocation5 + $0xe8] sm:$0xff]  ;;  %129 = vmatprep.subr.mxu0 %v73_v0  ;;  %v70_v3 = vld [vmem:[#allocation5 + $0xe0] sm:$0xff]  ;;  %v69_v4 = vld [vmem:[#allocation5 + $0xd8] sm:$0xff] }
  0x1c   :  { %130 = vmatpush1.msra.mxu0 %v72_v1  ;;  %v68_v5 = vld [vmem:[#allocation5 + $0xd0] sm:$0xff]  ;;  %v67_v6 = vld [vmem:[#allocation5 + $0xc8] sm:$0xff]  ;;  %v66_v7 = vld [vmem:[#allocation5 + $0xc0] sm:$0xff]  ;;  %v348_v18 = vshrl.u32 %v108_v13, 7  ;;  %vm224_vm0 = vcmp.lt.s32.totalorder %v108_v13, 256 }
  0x1d   :  { %131 = vmatprep.subr.mxu0 %v71_v2  ;;  %v65_v8 = vld [vmem:[#allocation5 + $0xb8] sm:$0xff]  ;;  %v64_v9 = vld [vmem:[#allocation5 + $0xb0] sm:$0xff]  ;;  %v63_v10 = vld [vmem:[#allocation5 + $0xa8] sm:$0xff] }
  0x1e   :  { %132 = vmatpush1.msra.mxu0 %v70_v3  ;;  %v62_v11 = vld [vmem:[#allocation5 + $0xa0] sm:$0xff]  ;;  %v61_v12 = vld [vmem:[#allocation5 + $0x98] sm:$0xff]  ;;  %v60_v14 = vld [vmem:[#allocation5 + $0x90] sm:$0xff]  ;;  %v114_v23 = vsub.s32 1, %v348_v18  ;;  %v110_v1 = vsub.s32 0, %v348_v18 }
  0x1f   :  { %133 = vmatprep.subr.mxu0 %v69_v4  ;;  %v59_v15 = vld [vmem:[#allocation5 + $0x88] sm:$0xff]  ;;  %v58_v16 = vld [vmem:[#allocation5 + $0x80] sm:$0xff]  ;;  %v57_v17 = vld [vmem:[#allocation5 + $0x78] sm:$0xff] }
  0x20   :  { %134 = vmatpush1.msra.mxu0 %v68_v5  ;;  %v56_v19 = vld [vmem:[#allocation5 + $0x70] sm:$0xff]  ;;  %v55_v20 = vld [vmem:[#allocation5 + $0x68] sm:$0xff]  ;;  %v54_v21 = vld [vmem:[#allocation5 + $0x60] sm:$0xff] }
  0x21   :  { %135 = vmatprep.subr.mxu0 %v67_v6  ;;  %v53_v22 = vld [vmem:[#allocation5 + $0x58] sm:$0xff]  ;;  %v52_v24 = vld [vmem:[#allocation5 + $0x50] sm:$0xff]  ;;  %v51_v25 = vld [vmem:[#allocation5 + $0x48] sm:$0xff] }
  0x22   :  { %136 = vmatpush1.msra.mxu0 %v66_v7  ;;  %v50_v26 = vld [vmem:[#allocation5 + $0x40] sm:$0xff]  ;;  %v351_v27 = vld [vmem:[#allocation2] sm:$0x3]  ;;  %v48_v30 = vld [vmem:[#allocation5 + $0x30] sm:$0xff] }
  0x23   :  { %137 = vmatprep.subr.mxu0 %v65_v8  ;;  %v49_v28 = vld [vmem:[#allocation5 + $0x38] sm:$0xff]  ;;  %v115_v29 = vrot.slane %v351_v27, %v114_v23  ;;  %v47_v31 = vld [vmem:[#allocation5 + $0x28] sm:$0xff]  ;;  %v46_v32 = vld [vmem:[#allocation5 + $0x20] sm:$0xff]  ;;  %v111_v6 = vrot.slane %v351_v27, %v110_v1 }
  0x24   :  { %138 = vmatpush1.msra.mxu0 %v64_v9  ;;  %v45_v33 = vld [vmem:[#allocation5 + $0x18] sm:$0xff]  ;;  %v44_v34 = vld [vmem:[#allocation5 + $0x10] sm:$0xff]  ;;  %v43_v35 = vld [vmem:[#allocation5 + $0x8] sm:$0xff] }
  0x25   :  { %139 = vmatprep.subr.mxu0 %v63_v10  ;;  %193 = vmatprep.mubr.f32.mxu0 %v115_v29  ;;  %v42_v36 = vld [vmem:[#allocation5] sm:$0xff]  ;;  %v105_v37 = vld [vmem:[#allocation5 + $0x1f8] sm:$0xff]  ;;  %v104_v38 = vld [vmem:[#allocation5 + $0x1f0] sm:$0xff]  ;;  %v319_v10 = vmov 1966171168  }
  0x26   :  { %140 = vmatpush1.msra.mxu0 %v62_v11  ;;  %v103_v39 = vld [vmem:[#allocation5 + $0x1e8] sm:$0xff]  ;;  %v102_v40 = vld [vmem:[#allocation5 + $0x1e0] sm:$0xff]  ;;  %v101_v41 = vld [vmem:[#allocation5 + $0x1d8] sm:$0xff]  ;;  %v208_v11 = vunpack.c.l.s4 %v319_v10 }
  0x27   :  { %141 = vmatprep.subr.mxu0 %v61_v12  ;;  %v100_v42 = vld [vmem:[#allocation5 + $0x1d0] sm:$0xff]  ;;  %v99_v43 = vld [vmem:[#allocation5 + $0x1c8] sm:$0xff]  ;;  %v98_v44 = vld [vmem:[#allocation5 + $0x1c0] sm:$0xff] }
  0x28   :  { %142 = vmatpush1.msra.mxu0 %v60_v14  ;;  %v97_v45 = vld [vmem:[#allocation5 + $0x1b8] sm:$0xff]  ;;  %v96_v46 = vld [vmem:[#allocation5 + $0x1b0] sm:$0xff]  ;;  %v95_v47 = vld [vmem:[#allocation5 + $0x1a8] sm:$0xff] }
  0x29   :  { %143 = vmatprep.subr.mxu0 %v59_v15  ;;  %v94_v48 = vld [vmem:[#allocation5 + $0x1a0] sm:$0xff]  ;;  %v93_v49 = vld [vmem:[#allocation5 + $0x198] sm:$0xff]  ;;  %v92_v50 = vld [vmem:[#allocation5 + $0x190] sm:$0xff] }
  0x2a   :  { %144 = vmatpush1.msra.mxu0 %v58_v16  ;;  %v91_v51 = vld [vmem:[#allocation5 + $0x188] sm:$0xff]  ;;  %v90_v52 = vld [vmem:[#allocation5 + $0x180] sm:$0xff]  ;;  %v89_v53 = vld [vmem:[#allocation5 + $0x178] sm:$0xff] }
  0x2b   :  { %145 = vmatprep.subr.mxu0 %v57_v17  ;;  %v88_v54 = vld [vmem:[#allocation5 + $0x170] sm:$0xff]  ;;  %v87_v55 = vld [vmem:[#allocation5 + $0x168] sm:$0xff]  ;;  %v86_v56 = vld [vmem:[#allocation5 + $0x160] sm:$0xff] }
  0x2c   :  { %146 = vmatpush1.msra.mxu0 %v56_v19  ;;  %v85_v57 = vld [vmem:[#allocation5 + $0x158] sm:$0xff]  ;;  %v84_v58 = vld [vmem:[#allocation5 + $0x150] sm:$0xff]  ;;  %v83_v59 = vld [vmem:[#allocation5 + $0x148] sm:$0xff]  ;;  %v209_v19 = vunpack.c.0.s8 %v208_v11 }
  0x2d   :  { %147 = vmatprep.subr.mxu0 %v55_v20  ;;  %v82_v60 = vld [vmem:[#allocation5 + $0x140] sm:$0xff]  ;;  %v81_v61 = vld [vmem:[#allocation5 + $0x138] sm:$0xff]  ;;  %v80_v62 = vld [vmem:[#allocation5 + $0x130] sm:$0xff] }
  0x2e   :  { %148 = vmatpush1.msra.mxu0 %v54_v21  ;;  %v79_v63 = vld [vmem:[#allocation5 + $0x128] sm:$0xff]  ;;  %v78_v0 = vld [vmem:[#allocation5 + $0x120] sm:$0xff]  ;;  %v77_v2 = vld [vmem:[#allocation5 + $0x118] sm:$0xff] }
  0x2f   :  { %149 = vmatprep.subr.mxu0 %v53_v22  ;;  %v76_v3 = vld [vmem:[#allocation5 + $0x110] sm:$0xff]  ;;  %v75_v4 = vld [vmem:[#allocation5 + $0x108] sm:$0xff]  ;;  %v74_v5 = vld [vmem:[#allocation5 + $0x100] sm:$0xff] }
  0x30   :  { %150 = vmatpush1.msra.mxu0 %v52_v24  ;;  %v106_v7 = vld [vmem:[%s370_s2] sm:$0x3]  ;;  %v212_v24 = vsub.s32 %v209_v19, %v348_v18  ;;  %s233_s2 = sshll.u32 %s320_s24, 4  ;;  %s234_s2 = int_to_ptr.vmem [resolvable:$true] %s233_s2 }
  0x31   :  { %151 = vmatprep.subr.mxu0 %v51_v25  ;;  %v122_v8 = vrot.slane %v106_v7, %v110_v1  ;;  %v126_v9 = vrot.slane %v106_v7, %v114_v23  ;;  %s289_s25 = scalar_lea.vmem %s234_s2, 32  ;;  %p294_p11 = scmp.lt.s32.totalorder %s234_s2, %s234_s2 }
  0x32   :  { %152 = vmatpush1.msra.mxu0 %v50_v26  ;;  %p290_p10 = scmp.ne.s32.totalorder %s234_s2, %s289_s25  ;;  %p295_p12 = scmp.lt.s32.totalorder %s289_s25, %s289_s25 }
  0x33   :  { %153 = vmatprep.subr.mxu0 %v49_v28 }
  0x34   :  { %154 = vmatpush1.msra.mxu0 %v48_v30  ;;  %p296_p13 = por %p295_p12, %p294_p11 }
  0x35   :  { %155 = vmatprep.subr.mxu0 %v47_v31 }
  0x36   :  { %156 = vmatpush1.msra.mxu0 %v46_v32  ;;  %p297_p0 = pnand %p296_p13, %p290_p10 }
  0x37   :  { %157 = vmatprep.subr.mxu0 %v45_v33 }
  0x38   :  { %158 = vmatpush1.msra.mxu0 %v44_v34 }
  0x39   :  { %159 = vmatprep.subr.mxu0 %v43_v35 }
  0x3a   :  { %160 = vmatpush1.msra.mxu0 %v42_v36 }
  0x3b   :  { %161 = vmatprep.subr.mxu0 %v105_v37 }
  0x3c   :  { %162 = vmatpush2.msra.mxu0 %v104_v38 }
  0x3d   :  { %163 = vmatprep.subr.mxu0 %v103_v39 }
  0x3e   :  { %164 = vmatpush2.msra.mxu0 %v102_v40 }
  0x3f   :  { %165 = vmatprep.subr.mxu0 %v101_v41 }
  0x40   :  { %166 = vmatpush2.msra.mxu0 %v100_v42 }
  0x41   :  { %167 = vmatprep.subr.mxu0 %v99_v43 }
  0x42   :  { %168 = vmatpush2.msra.mxu0 %v98_v44 }
  0x43   :  { %169 = vmatprep.subr.mxu0 %v97_v45 }
  0x44   :  { %170 = vmatpush2.msra.mxu0 %v96_v46 }
  0x45   :  { %171 = vmatprep.subr.mxu0 %v95_v47 }
  0x46   :  { %172 = vmatpush2.msra.mxu0 %v94_v48 }
  0x47   :  { %173 = vmatprep.subr.mxu0 %v93_v49 }
  0x48   :  { %174 = vmatpush2.msra.mxu0 %v92_v50 }
  0x49   :  { %175 = vmatprep.subr.mxu0 %v91_v51 }
  0x4a   :  { %176 = vmatpush2.msra.mxu0 %v90_v52 }
  0x4b   :  { %177 = vmatprep.subr.mxu0 %v89_v53 }
  0x4c   :  { %178 = vmatpush2.msra.mxu0 %v88_v54 }
  0x4d   :  { %179 = vmatprep.subr.mxu0 %v87_v55 }
  0x4e   :  { %180 = vmatpush2.msra.mxu0 %v86_v56 }
  0x4f   :  { %181 = vmatprep.subr.mxu0 %v85_v57 }
  0x50   :  { %182 = vmatpush2.msra.mxu0 %v84_v58 }
  0x51   :  { %183 = vmatprep.subr.mxu0 %v83_v59 }
  0x52   :  { %184 = vmatpush2.msra.mxu0 %v82_v60 }
  0x53   :  { %185 = vmatprep.subr.mxu0 %v81_v61 }
  0x54   :  { %186 = vmatpush2.msra.mxu0 %v80_v62 }
  0x55   :  { %187 = vmatprep.subr.mxu0 %v79_v63 }
  0x56   :  { %188 = vmatpush2.msra.mxu0 %v78_v0 }
  0x57   :  { %189 = vmatprep.subr.mxu0 %v77_v2 }
  0x58   :  { %190 = vmatpush2.msra.mxu0 %v76_v3 }
  0x59   :  { %191 = vmatprep.subr.mxu0 %v75_v4 }
  0x5a   :  { %192 = vmatpush2.msra.mxu0 %v74_v5 }
  0x5b   :  { %194 = vmatmul.mubr.f32.vlgmr.msra.gmra.mxu0 %v111_v6 }
 0x11b   :  { %v195_v12 = vpop.f32.mrf.mxu0 }
 0x11c   :  { %v196_v14 = vadd.f32 %v195_v12, %v122_v8 }
 0x11d   :  { %v197_v15 = vpop.f32.mrf.mxu0 }
 0x11e   :  { %v200_v16 = vmax.f32 %v196_v14, 0.0  ;;  %v198_v17 = vadd.f32 %v197_v15, %v126_v9 }
 0x120   :  { %v201_v20 = vmax.f32 %v198_v17, 0.0  ;;  %v202_v21 = vmin.f32 %v200_v16, 1.0 }
 0x122   :  { %v203_v22 = vmin.f32 %v201_v20, 1.0 }
 0x124   :  { %v206_v25 = vcombine.low %v202_v21, %v203_v22 }
 0x126   :  { %v213_v26 = vrot.slane %v206_v25, %v212_v24 }
 0x128   :  { %v220_v23 = vrot.slane %v213_v26, %v212_v24 }
 0x12a   :  { %226 = vst.msk [vmem:[#allocation7] sm:$0x3] %vm224_vm0, %v220_v23 }
 0x12b   :  { %300 = shalt.err (!%p297_p0)
}
 0x12c   :  { %236 = dma.vmem_to_hbm [thread:$0]  %s234_s2, 32, %s371_s3, [#allocation4]  }
 0x12d   :  { %313 = dma.done.wait [#allocation4], 32  }
 0x12e   :  { %314 = vsyncadd [#allocation4], 4294967264 }
 0x12f   :  { %240 = vsyncpa [#allocation3], 1 }
 0x130   :  { %241 = vsyncpa [#allocation6], 1 }
 0x131   :  { %242 = vsyncpa [#allocation4], 1 }

</bundles_post_ra>
